<compile_context>
chip_gen: v7x
topology: tpu7x:2x2x1
jax: 0.10.0
libtpu: 0.0.40
codegen_flags: <defaults>
</compile_context>

<pallas_src>
import functools
import math

import jax
import jax.numpy as jnp
from jax.experimental import pallas as pl
from jax.experimental.pallas import tpu as pltpu


def _attention_kernel(x_ref, wqkv_ref, bqkv_ref, wo_ref, bo_ref,
                      out_ref, attn_ref, *, num_heads, head_dim):
    """One grid step == one batch element. Everything fits in VMEM at these sizes."""
    n_h, d = num_heads, head_dim
    S = x_ref.shape[1]
    H = x_ref.shape[2]
    scale = 1.0 / math.sqrt(d)

    x = x_ref[0]                                           # (S, H)

    # Fused, head-major QKV projection: one batched contraction -> (3*nH, S, d).
    g = 3 * n_h
    xb = jnp.broadcast_to(x, (g, S, H))
    qkv = jnp.einsum("gsh,ghd->gsd", xb, wqkv_ref[...],
                     preferred_element_type=jnp.float32) + bqkv_ref[...]

    q = qkv[0:n_h]                                         # (nH, S, d)
    k = qkv[n_h:2 * n_h]                                   # (nH, S, d)
    v = qkv[2 * n_h:3 * n_h]                               # (nH, S, d)

    # Scores + numerically stable softmax, batched over heads.
    scores = jnp.einsum("nqd,nkd->nqk", q, k,
                        preferred_element_type=jnp.float32) * scale
    m = jnp.max(scores, axis=-1, keepdims=True)
    e = jnp.exp(scores - m)
    denom = jnp.sum(e, axis=-1, keepdims=True)
    inv = pl.reciprocal(denom, approx=True)                # EUP slot (free-ish)
    inv = inv * (2.0 - denom * inv)                        # one Newton step -> full f32 accuracy
    probs = e * inv                                        # (nH, S, S)

    attn_ref[0] = probs                                    # single slab store (no per-head writes)

    # Context, batched over heads.
    ctx = jnp.einsum("nqk,nkd->nqd", probs, v,
                     preferred_element_type=jnp.float32)   # (nH, S, d)

    # Output projection with the head merge folded in:
    #   out[s, j] = sum_n sum_d ctx[n, s, d] * Wo_h[n, d, j] + bo[j]
    out_h = jnp.einsum("nsd,ndj->nsj", ctx, wo_ref[...],
                       preferred_element_type=jnp.float32)  # (nH, S, H)
    out = jnp.sum(out_h, axis=0) + bo_ref[0]
    out_ref[0] = out.astype(out_ref.dtype)


def attention_forward(x, wq, bq, wk, bk, wv, bv, wo, bo, *, num_heads):
    """x: (B, S, H). w*: PyTorch nn.Linear layout (out, in); b*: (out,)."""
    B, S, H = x.shape
    d = H // num_heads

    # --- wrapper-side weight packing (all layout plumbing done outside the kernel) ---
    def _heads(w):
        # (H_out, H_in) -> (nH, H_in, d): head-major output columns.
        return jnp.transpose(w.T.reshape(H, num_heads, d), (1, 0, 2))

    wqkv = jnp.concatenate([_heads(wq), _heads(wk), _heads(wv)], axis=0)   # (3nH, H, d)
    bqkv = jnp.concatenate([bq, bk, bv]).reshape(3 * num_heads, 1, d)       # (3nH, 1, d)
    wo_h = wo.T.reshape(num_heads, d, H)                                    # (nH, d, H)
    bo2 = bo.reshape(1, H)                                                  # (1, H)

    kernel = functools.partial(_attention_kernel, num_heads=num_heads,
                               head_dim=d)

    out, attn = pl.pallas_call(
        kernel,
        out_shape=(
            jax.ShapeDtypeStruct((B, S, H), x.dtype),
            jax.ShapeDtypeStruct((B, num_heads, S, S), jnp.float32),
        ),
        grid_spec=pltpu.PrefetchScalarGridSpec(
            num_scalar_prefetch=0,
            grid=(B,),
            in_specs=[
                pl.BlockSpec((1, S, H), lambda b: (b, 0, 0)),                 # x
                pl.BlockSpec((3 * num_heads, H, d), lambda b: (0, 0, 0)),     # fused QKV weights
                pl.BlockSpec((3 * num_heads, 1, d), lambda b: (0, 0, 0)),     # fused QKV biases
                pl.BlockSpec((num_heads, d, H), lambda b: (0, 0, 0)),         # Wo (head-split)
                pl.BlockSpec((1, H), lambda b: (0, 0)),                       # bo
            ],
            out_specs=[
                pl.BlockSpec((1, S, H), lambda b: (b, 0, 0)),
                pl.BlockSpec((1, num_heads, S, S), lambda b: (b, 0, 0, 0)),
            ],
        ),
        compiler_params=pltpu.CompilerParams(
            dimension_semantics=("parallel",)),            # batch shards across v7x's 2 TCs
    )(x, wqkv, bqkv, wo_h, bo2)
    return out, attn


def _init_linear(key, in_f, out_f):
    """PyTorch nn.Linear-style init: U(-1/sqrt(in), 1/sqrt(in)); W is (out, in)."""
    k1, k2 = jax.random.split(key)
    bound = 1.0 / math.sqrt(in_f)
    w = jax.random.uniform(k1, (out_f, in_f), jnp.float32, -bound, bound)
    b = jax.random.uniform(k2, (out_f,), jnp.float32, -bound, bound)
    return w, b


if __name__ == "__main__":
    # Small config consistent with the module: hidden_size=32, num_heads=4, seq=8, batch=2.
    B, S, H, NUM_HEADS = 2, 8, 32, 4

    key = jax.random.PRNGKey(0)
    kx, kq, kk, kv, ko = jax.random.split(key, 5)

    x = jax.random.normal(kx, (B, S, H), jnp.float32)
    wq, bq = _init_linear(kq, H, H)
    wk, bk = _init_linear(kk, H, H)
    wv, bv = _init_linear(kv, H, H)
    wo, bo = _init_linear(ko, H, H)

    out, attn_weights = attention_forward(
        x, wq, bq, wk, bk, wv, bv, wo, bo, num_heads=NUM_HEADS)
    jax.block_until_ready((out, attn_weights))

    # Pure-JAX reference (same math as the PyTorch forward, eval mode => dropout is identity).
    def ref(x):
        q = x @ wq.T + bq
        k = x @ wk.T + bk
        v = x @ wv.T + bv
        d = H // NUM_HEADS

        def split(t):  # (B,S,H) -> (B,nH,S,d)
            return t.reshape(B, S, NUM_HEADS, d).transpose(0, 2, 1, 3)

        qh, kh, vh = split(q), split(k), split(v)
        scores = jnp.einsum("bhqd,bhkd->bhqk", qh, kh) / math.sqrt(d)
        probs = jax.nn.softmax(scores, axis=-1)
        ctx = jnp.einsum("bhqk,bhkd->bhqd", probs, vh)
        ctx = ctx.transpose(0, 2, 1, 3).reshape(B, S, H)
        return ctx @ wo.T + bo, probs

    ref_out, ref_probs = ref(x)
    assert jnp.allclose(out, ref_out, atol=1e-4, rtol=1e-4)
    assert jnp.allclose(attn_weights, ref_probs, atol=1e-4, rtol=1e-4)

    print("KERNEL_OK")
</pallas_src>

<mosaic_0001>
module attributes {stable_mosaic.version = 11 : i64} {
  func.func @_attention_kernel(%arg0: i32, %arg1: memref<1x8x32xf32, #tpu.memory_space<vmem>>, %arg2: memref<12x32x8xf32, #tpu.memory_space<vmem>>, %arg3: memref<12x1x8xf32, #tpu.memory_space<vmem>>, %arg4: memref<4x8x32xf32, #tpu.memory_space<vmem>>, %arg5: memref<1x32xf32, #tpu.memory_space<vmem>>, %arg6: memref<1x8x32xf32, #tpu.memory_space<vmem>>, %arg7: memref<1x4x8x8xf32, #tpu.memory_space<vmem>>) attributes {dimension_semantics = [#tpu.dimension_semantics<parallel>], iteration_bounds = array<i64: 2>, scalar_prefetch = 0 : i64, scratch_operands = 0 : i64, tpu.core_type = #tpu.core_type<tc>, window_params = [{transform_indices = @transform_0, window_bounds = array<i64: 1, 8, 32>}, {pipeline_mode = #tpu.pipeline_mode<synchronous>, transform_indices = @transform_1, window_bounds = array<i64: 12, 32, 8>}, {pipeline_mode = #tpu.pipeline_mode<synchronous>, transform_indices = @transform_2, window_bounds = array<i64: 12, 1, 8>}, {pipeline_mode = #tpu.pipeline_mode<synchronous>, transform_indices = @transform_3, window_bounds = array<i64: 4, 8, 32>}, {pipeline_mode = #tpu.pipeline_mode<synchronous>, transform_indices = @transform_4, window_bounds = array<i64: 1, 32>}, {transform_indices = @transform_5, window_bounds = array<i64: 1, 8, 32>}, {transform_indices = @transform_6, window_bounds = array<i64: 1, 4, 8, 8>}]} {
    %c0 = arith.constant 0 : index
    %c0_0 = arith.constant 0 : index
    %c0_1 = arith.constant 0 : index
    %0 = vector.load %arg1[%c0, %c0_0, %c0_1] : memref<1x8x32xf32, #tpu.memory_space<vmem>>, vector<1x8x32xf32>
    %1 = vector.shape_cast %0 : vector<1x8x32xf32> to vector<8x32xf32>
    %2 = vector.shape_cast %1 : vector<8x32xf32> to vector<1x8x32xf32>
    %3 = vector.broadcast %2 : vector<1x8x32xf32> to vector<12x8x32xf32>
    %c0_2 = arith.constant 0 : index
    %c0_3 = arith.constant 0 : index
    %c0_4 = arith.constant 0 : index
    %4 = vector.load %arg2[%c0_2, %c0_3, %c0_4] : memref<12x32x8xf32, #tpu.memory_space<vmem>>, vector<12x32x8xf32>
    "tpu.trace_start"() <{level = 10 : i32, message = "gsh,ghd->gsd"}> : () -> ()
    %cst = arith.constant dense<0.000000e+00> : vector<12x8x8xf32>
    %5 = tpu.matmul %3, %4, %cst {dimension_numbers = #tpu.dot_dimension_numbers<[2], [1], [1], [2], [0, 0, 0, 1, 1, 2], [0], [0]>} : vector<12x8x32xf32>, vector<12x32x8xf32>, vector<12x8x8xf32> -> vector<12x8x8xf32>
    "tpu.trace_stop"() : () -> ()
    %c0_5 = arith.constant 0 : index
    %c0_6 = arith.constant 0 : index
    %c0_7 = arith.constant 0 : index
    %6 = vector.load %arg3[%c0_5, %c0_6, %c0_7] : memref<12x1x8xf32, #tpu.memory_space<vmem>>, vector<12x1x8xf32>
    %7 = vector.broadcast %6 : vector<12x1x8xf32> to vector<12x8x8xf32>
    %8 = arith.addf %5, %7 : vector<12x8x8xf32>
    %9 = vector.extract_strided_slice %8 {offsets = [0, 0, 0], sizes = [4, 8, 8], strides = [1, 1, 1]} : vector<12x8x8xf32> to vector<4x8x8xf32>
    %10 = vector.extract_strided_slice %8 {offsets = [4, 0, 0], sizes = [4, 8, 8], strides = [1, 1, 1]} : vector<12x8x8xf32> to vector<4x8x8xf32>
    %11 = vector.extract_strided_slice %8 {offsets = [8, 0, 0], sizes = [4, 8, 8], strides = [1, 1, 1]} : vector<12x8x8xf32> to vector<4x8x8xf32>
    "tpu.trace_start"() <{level = 10 : i32, message = "nqd,nkd->nqk"}> : () -> ()
    %cst_8 = arith.constant dense<0.000000e+00> : vector<4x8x8xf32>
    %12 = tpu.matmul %9, %10, %cst_8 {dimension_numbers = #tpu.dot_dimension_numbers<[2], [2], [1], [1], [0, 0, 0, 1, 1, 1], [0], [0]>} : vector<4x8x8xf32>, vector<4x8x8xf32>, vector<4x8x8xf32> -> vector<4x8x8xf32>
    "tpu.trace_stop"() : () -> ()
    %cst_9 = arith.constant 0.353553385 : f32
    %13 = vector.broadcast %cst_9 : f32 to vector<4x8x8xf32>
    %14 = arith.mulf %12, %13 : vector<4x8x8xf32>
    %cst_10 = arith.constant dense<0xFF800000> : vector<4x8xf32>
    %15 = vector.multi_reduction <maximumf>, %14, %cst_10 [2] : vector<4x8x8xf32> to vector<4x8xf32>
    %16 = vector.shape_cast %15 : vector<4x8xf32> to vector<4x8x1xf32>
    %17 = vector.broadcast %16 : vector<4x8x1xf32> to vector<4x8x8xf32>
    %18 = arith.subf %14, %17 : vector<4x8x8xf32>
    %19 = math.exp %18 : vector<4x8x8xf32>
    %cst_11 = arith.constant dense<0.000000e+00> : vector<4x8xf32>
    %20 = vector.multi_reduction <add>, %19, %cst_11 [2] : vector<4x8x8xf32> to vector<4x8xf32>
    %21 = vector.shape_cast %20 : vector<4x8xf32> to vector<4x8x1xf32>
    %22 = tpu.reciprocal %21 {approx = true} : vector<4x8x1xf32> -> vector<4x8x1xf32>
    %23 = arith.mulf %21, %22 : vector<4x8x1xf32>
    %cst_12 = arith.constant 2.000000e+00 : f32
    %24 = vector.broadcast %cst_12 : f32 to vector<4x8x1xf32>
    %25 = arith.subf %24, %23 : vector<4x8x1xf32>
    %26 = arith.mulf %22, %25 : vector<4x8x1xf32>
    %27 = vector.broadcast %26 : vector<4x8x1xf32> to vector<4x8x8xf32>
    %28 = arith.mulf %19, %27 : vector<4x8x8xf32>
    %c0_13 = arith.constant 0 : index
    %c0_14 = arith.constant 0 : index
    %c0_15 = arith.constant 0 : index
    %c0_16 = arith.constant 0 : index
    %29 = vector.load %arg7[%c0_13, %c0_14, %c0_15, %c0_16] : memref<1x4x8x8xf32, #tpu.memory_space<vmem>>, vector<1x4x8x8xf32>
    %30 = vector.shape_cast %29 : vector<1x4x8x8xf32> to vector<4x8x8xf32>
    %31 = vector.shape_cast %28 : vector<4x8x8xf32> to vector<1x4x8x8xf32>
    tpu.vector_store %arg7[%c0_13, %c0_14, %c0_15, %c0_16], %31 {strides = array<i32>} : memref<1x4x8x8xf32, #tpu.memory_space<vmem>>, vector<1x4x8x8xf32>,
    "tpu.trace_start"() <{level = 10 : i32, message = "nqk,nkd->nqd"}> : () -> ()
    %cst_17 = arith.constant dense<0.000000e+00> : vector<4x8x8xf32>
    %32 = tpu.matmul %28, %11, %cst_17 {dimension_numbers = #tpu.dot_dimension_numbers<[2], [1], [1], [2], [0, 0, 0, 1, 1, 2], [0], [0]>} : vector<4x8x8xf32>, vector<4x8x8xf32>, vector<4x8x8xf32> -> vector<4x8x8xf32>
    "tpu.trace_stop"() : () -> ()
    %c0_18 = arith.constant 0 : index
    %c0_19 = arith.constant 0 : index
    %c0_20 = arith.constant 0 : index
    %33 = vector.load %arg4[%c0_18, %c0_19, %c0_20] : memref<4x8x32xf32, #tpu.memory_space<vmem>>, vector<4x8x32xf32>
    "tpu.trace_start"() <{level = 10 : i32, message = "nsd,ndj->nsj"}> : () -> ()
    %cst_21 = arith.constant dense<0.000000e+00> : vector<4x8x32xf32>
    %34 = tpu.matmul %32, %33, %cst_21 {dimension_numbers = #tpu.dot_dimension_numbers<[2], [1], [1], [2], [0, 0, 0, 1, 1, 2], [0], [0]>} : vector<4x8x8xf32>, vector<4x8x32xf32>, vector<4x8x32xf32> -> vector<4x8x32xf32>
    "tpu.trace_stop"() : () -> ()
    %cst_22 = arith.constant dense<0.000000e+00> : vector<8x32xf32>
    %35 = vector.multi_reduction <add>, %34, %cst_22 [0] : vector<4x8x32xf32> to vector<8x32xf32>
    %c0_23 = arith.constant 0 : index
    %c0_24 = arith.constant 0 : index
    %36 = vector.load %arg5[%c0_23, %c0_24] : memref<1x32xf32, #tpu.memory_space<vmem>>, vector<1x32xf32>
    %37 = vector.shape_cast %36 : vector<1x32xf32> to vector<32xf32>
    %38 = vector.shape_cast %37 : vector<32xf32> to vector<1x32xf32>
    %39 = vector.broadcast %38 : vector<1x32xf32> to vector<8x32xf32>
    %40 = arith.addf %35, %39 : vector<8x32xf32>
    %c0_25 = arith.constant 0 : index
    %c0_26 = arith.constant 0 : index
    %c0_27 = arith.constant 0 : index
    %41 = vector.load %arg6[%c0_25, %c0_26, %c0_27] : memref<1x8x32xf32, #tpu.memory_space<vmem>>, vector<1x8x32xf32>
    %42 = vector.shape_cast %41 : vector<1x8x32xf32> to vector<8x32xf32>
    %43 = vector.shape_cast %40 : vector<8x32xf32> to vector<1x8x32xf32>
    tpu.vector_store %arg6[%c0_25, %c0_26, %c0_27], %43 {strides = array<i32>} : memref<1x8x32xf32, #tpu.memory_space<vmem>>, vector<1x8x32xf32>,
    return
  }
  func.func @transform_0(%arg0: i32) -> (i32, i32, i32) {
    %c0_i32 = arith.constant 0 : i32
    %c0_i32_0 = arith.constant 0 : i32
    %c0_i32_1 = arith.constant 0 : i32
    return %arg0, %c0_i32, %c0_i32_0 : i32, i32, i32
  }
  func.func @transform_1(%arg0: i32) -> (i32, i32, i32) {
    %c0_i32 = arith.constant 0 : i32
    %c0_i32_0 = arith.constant 0 : i32
    %c0_i32_1 = arith.constant 0 : i32
    %c0_i32_2 = arith.constant 0 : i32
    return %c0_i32, %c0_i32_0, %c0_i32_1 : i32, i32, i32
  }
  func.func @transform_2(%arg0: i32) -> (i32, i32, i32) {
    %c0_i32 = arith.constant 0 : i32
    %c0_i32_0 = arith.constant 0 : i32
    %c0_i32_1 = arith.constant 0 : i32
    %c0_i32_2 = arith.constant 0 : i32
    return %c0_i32, %c0_i32_0, %c0_i32_1 : i32, i32, i32
  }
  func.func @transform_3(%arg0: i32) -> (i32, i32, i32) {
    %c0_i32 = arith.constant 0 : i32
    %c0_i32_0 = arith.constant 0 : i32
    %c0_i32_1 = arith.constant 0 : i32
    %c0_i32_2 = arith.constant 0 : i32
    return %c0_i32, %c0_i32_0, %c0_i32_1 : i32, i32, i32
  }
  func.func @transform_4(%arg0: i32) -> (i32, i32) {
    %c0_i32 = arith.constant 0 : i32
    %c0_i32_0 = arith.constant 0 : i32
    %c0_i32_1 = arith.constant 0 : i32
    return %c0_i32, %c0_i32_0 : i32, i32
  }
  func.func @transform_5(%arg0: i32) -> (i32, i32, i32) {
    %c0_i32 = arith.constant 0 : i32
    %c0_i32_0 = arith.constant 0 : i32
    %c0_i32_1 = arith.constant 0 : i32
    return %arg0, %c0_i32, %c0_i32_0 : i32, i32, i32
  }
  func.func @transform_6(%arg0: i32) -> (i32, i32, i32, i32) {
    %c0_i32 = arith.constant 0 : i32
    %c0_i32_0 = arith.constant 0 : i32
    %c0_i32_1 = arith.constant 0 : i32
    %c0_i32_2 = arith.constant 0 : i32
    return %arg0, %c0_i32, %c0_i32_0, %c0_i32_1 : i32, i32, i32, i32
  }
}

</mosaic_0001>

<bundles_post_ra>
// kernel: tpu_custom_call.1
= control target key start
LH: loop header
LB: loop body
LE: loop exit
PB: predicated region body
PF: predicated region fallthrough
CT: control target
= control target key end

     0   :  { %12 = vsyncpa [#allocation3], 0  ;;  %s3429_s0 = inlined_call_operand.vmem [shape: f32[2,8,32], index: 0, kind: input, shape index: {}]   ;;  %s3430_s1 = inlined_call_operand.vmem [shape: f32[12,32,8], index: 1, kind: input, shape index: {}]   ;;  %s3431_s2 = inlined_call_operand.vmem [shape: f32[12,1,8], index: 2, kind: input, shape index: {}]   ;;  %s3432_s3 = inlined_call_operand.vmem [shape: f32[4,8,32], index: 3, kind: input, shape index: {}]   ;;  %s3433_s4 = inlined_call_operand.vmem [shape: f32[1,32], index: 4, kind: input, shape index: {}]   ;;  %s3434_s5 = inlined_call_operand.hbm [shape: f32[2,8,32], index: 5, kind: output, shape index: {0}]   ;;  %s3435_s6 = inlined_call_operand.hbm [shape: f32[2,4,8,8], index: 6, kind: output, shape index: {1}]  }
   0x1   :  { %14 = vsyncpa [#allocation3 + $0x1], 0 }
   0x2   :  { %15 = vsyncpa [#allocation5], 0 }
   0x3   :  { %17 = vsyncpa [#allocation5 + $0x1], 0  ;;  %s2941_s21 = smov 0   ;;  %s2943_s22 = smov 0  }
   0x4   :  { %s2945_s23 = smov 0   ;;  %s2947_s24 = smov 0  }
   0x5 LB: > { %s2962_s25 = sadd.s32 4294967295, %s2897_s24   ;;  %s2334_s26 = sadd.s32 4294967294, %s2897_s24   ;;  %s2897_s24 = sphi %s2947_s24, %s3441_s24   ;;  %s2893_s23 = sphi %s2945_s23, %s3440_s23   ;;  %s2889_s22 = sphi %s2943_s22, %s3439_s22   ;;  %s2885_s21 = sphi %s2941_s21, %s3438_s21  }
   0x6   : > { %s2966_s27 = sadd.s32 1, %s2897_s24   ;;  %s140_s28 = sadd.s32 1, %s2893_s23 }
   0x7   : > { %s137_s29 = ssub.s32 %s2897_s24, %s2966_s27  ;;  %p150_p0 = scmp.ne.s32.totalorder %s2893_s23, %s2889_s22 }
   0x8   : > { %p138_p1 = scmp.eq.s32.totalorder %s137_s29, 0  ;;  %p151_p2 = scmp.eq.s32.totalorder %s2962_s25, 1 }
   0x9   : > { %p156_p3 = scmp.ne.s32.totalorder %s2889_s22, %s2885_s21  ;;  %p157_p4 = scmp.eq.s32.totalorder %s2334_s26, 1 }
   0xa   : > { %s2977_s30 = scalar_select %p138_p1, %s2893_s23, %s140_s28  }
   0xb   : > { %p2979_p5 = por %p151_p2, %p150_p0  ;;  %p2983_p6 = por %p157_p4, %p156_p3 }
   0xc   : > { %p2337_p7 = scmp.ge.s32.totalorder %s2897_s24, 1  ;;  %p220_p8 = scmp.lt.s32.totalorder %s2897_s24, 3 }
   0xe   : > { %p221_p9 = pnand %p2337_p7, %p220_p8 }
   0xf   : > { %v259_v0 = vld [vmem:[%s3430_s1] sm:$0xff] (!%p221_p9)  ;;  %v260_v1 = vld [vmem:[%s3430_s1 + $0x8] sm:$0xff] (!%p221_p9)  ;;  %v2899_v3 = vmov (!%p221_p9), 0.0|0.0   ;;  %v261_v6 = vld [vmem:[%s3430_s1 + $0x10] sm:$0xff] (!%p221_p9)  ;;  %p254_p10 = scmp.lt.s32.totalorder (!%p221_p9), %s2962_s25, 1  ;;  %vm2900_vm0 = vmmov (!%p221_p9), 0  }
  0x10   : > { %224 = sbr.rel (%p221_p9) target bundleno = 1250 (0x4e2), region = 40  ;;  %v263_v2 = vld [vmem:[%s3430_s1 + $0x20] sm:$0xff] (!%p221_p9)  ;;  %2666 = vmatprep.subr.bf16.mxu0 (!%p221_p9), %v2899_v3  ;;  %2672 = vmatprep.subr.bf16.mxu1 (!%p221_p9), %v2899_v3  ;;  %v2667_v4 = vpack.c.bf16 (!%p221_p9), %v260_v1, %v259_v0  ;;  %v264_v5 = vld [vmem:[%s3430_s1 + $0x28] sm:$0xff] (!%p221_p9)  ;;  %v262_v7 = vld [vmem:[%s3430_s1 + $0x18] sm:$0xff] (!%p221_p9)  ;;  %v2901_v11 = vmov (!%p221_p9), 0.0   ;;  %vm391_vm1 = vcmask (!%p221_p9), 261120  }
  0x11   : > { %v2673_v8 = vpack.c.bf16 (!%p221_p9), %v264_v5, %v263_v2  ;;  %v265_v9 = vld [vmem:[%s3430_s1 + $0x30] sm:$0xff] (!%p221_p9)  ;;  %v266_v10 = vld [vmem:[%s3430_s1 + $0x38] sm:$0xff] (!%p221_p9)  ;;  %2482 = vmatprep.mubr.msk.f32.mxu0 (!%p221_p9), %vm2900_vm0, %v2901_v11  ;;  %2493 = vmatprep.mubr.msk.f32.mxu1 (!%p221_p9), %vm2900_vm0, %v2901_v11  ;;  %v2670_v12 = vpack.c.bf16 (!%p221_p9), %v262_v7, %v261_v6  ;;  %v267_v14 = vld [vmem:[%s3430_s1 + $0x40] sm:$0xff] (!%p221_p9)  ;;  %vm1235_vm2 = vcmask (!%p221_p9), 64512   ;;  %s2389_s12 = sshll.u32 (!%p221_p9), %s2962_s25, 9  ;;  %s2902_s19 = smov (!%p221_p9), [#allocation4]  }
  0x12   : > { %2668 = vmatpush3.bf16.msra.mxu0 (!%p221_p9), %v2667_v4  ;;  %v2676_v13 = vpack.c.bf16 (!%p221_p9), %v266_v10, %v265_v9  ;;  %v268_v15 = vld [vmem:[%s3430_s1 + $0x48] sm:$0xff] (!%p221_p9)  ;;  %v271_v16 = vld [vmem:[%s3430_s1 + $0x60] sm:$0xff] (!%p221_p9)  ;;  %v269_v21 = vld [vmem:[%s3430_s1 + $0x50] sm:$0xff] (!%p221_p9)  ;;  %s2807_s20 = sshll.u32 (!%p221_p9), %s2902_s19, 4  ;;  %s2808_s20 = int_to_ptr.vmem [resolvable:$false] %s2807_s20 }
  0x13   : > { %2674 = vmatpush3.bf16.msra.mxu1 (!%p221_p9), %v2673_v8  ;;  %2669 = vmatprep.subr.bf16.mxu0 (!%p221_p9), %v2899_v3  ;;  %v272_v17 = vld [vmem:[%s3430_s1 + $0x68] sm:$0xff] (!%p221_p9)  ;;  %v2679_v19 = vpack.c.bf16 (!%p221_p9), %v268_v15, %v267_v14  ;;  %v270_v22 = vld [vmem:[%s3430_s1 + $0x58] sm:$0xff] (!%p221_p9)  ;;  %v273_v23 = vld [vmem:[%s3430_s1 + $0x70] sm:$0xff] (!%p221_p9) }
  0x14   : > { %2675 = vmatprep.subr.bf16.mxu1 (!%p221_p9), %v2899_v3  ;;  %v2685_v20 = vpack.c.bf16 (!%p221_p9), %v272_v17, %v271_v16  ;;  %v274_v24 = vld [vmem:[%s3430_s1 + $0x78] sm:$0xff] (!%p221_p9)  ;;  %v2682_v25 = vpack.c.bf16 (!%p221_p9), %v270_v22, %v269_v21  ;;  %v275_v27 = vld [vmem:[%s3430_s1 + $0x80] sm:$0xff] (!%p221_p9)  ;;  %v276_v28 = vld [vmem:[%s3430_s1 + $0x88] sm:$0xff] (!%p221_p9) }
  0x15   : > { %v2688_v26 = vpack.c.bf16 (!%p221_p9), %v274_v24, %v273_v23  ;;  %v279_v29 = vld [vmem:[%s3430_s1 + $0xa0] sm:$0xff] (!%p221_p9)  ;;  %v280_v30 = vld [vmem:[%s3430_s1 + $0xa8] sm:$0xff] (!%p221_p9)  ;;  %v2691_v31 = vpack.c.bf16 (!%p221_p9), %v276_v28, %v275_v27  ;;  %v277_v33 = vld [vmem:[%s3430_s1 + $0x90] sm:$0xff] (!%p221_p9) }
  0x16   : > { %2671 = vmatpush3.bf16.msra.mxu0 (!%p221_p9), %v2670_v12  ;;  %v2697_v32 = vpack.c.bf16 (!%p221_p9), %v280_v30, %v279_v29  ;;  %v278_v34 = vld [vmem:[%s3430_s1 + $0x98] sm:$0xff] (!%p221_p9)  ;;  %v281_v35 = vld [vmem:[%s3430_s1 + $0xb0] sm:$0xff] (!%p221_p9)  ;;  %v283_v39 = vld [vmem:[%s3430_s1 + $0xc0] sm:$0xff] (!%p221_p9) }
  0x17   : > { %s255_s10 = scalar_select %p254_p10, %s2962_s25, 1  ;;  %2677 = vmatpush3.bf16.msra.mxu1 %v2676_v13  ;;  %2678 = vmatprep.subr.bf16.mxu0 %v2899_v3  ;;  %v282_v36 = vld [vmem:[%s3430_s1 + $0xb8] sm:$0xff]  ;;  %v2694_v37 = vpack.c.bf16 %v278_v34, %v277_v33  ;;  %v284_v40 = vld [vmem:[%s3430_s1 + $0xc8] sm:$0xff]  ;;  %v287_v41 = vld [vmem:[%s3430_s1 + $0xe0] sm:$0xff] }
  0x18   : > { %2684 = vmatprep.subr.bf16.mxu1 %v2899_v3  ;;  %v2700_v38 = vpack.c.bf16 %v282_v36, %v281_v35  ;;  %v288_v42 = vld [vmem:[%s3430_s1 + $0xe8] sm:$0xff]  ;;  %v2703_v43 = vpack.c.bf16 %v284_v40, %v283_v39  ;;  %v285_v45 = vld [vmem:[%s3430_s1 + $0xd0] sm:$0xff]  ;;  %v286_v46 = vld [vmem:[%s3430_s1 + $0xd8] sm:$0xff] }
  0x19   : > { %s2340_s15 = sshll.u32 %s255_s10, 3  ;;  %v2709_v44 = vpack.c.bf16 %v288_v42, %v287_v41  ;;  %v289_v47 = vld [vmem:[%s3430_s1 + $0xf0] sm:$0xff]  ;;  %v290_v48 = vld [vmem:[%s3430_s1 + $0xf8] sm:$0xff]  ;;  %v2706_v49 = vpack.c.bf16 %v286_v46, %v285_v45  ;;  %v291_v51 = vld [vmem:[%s3430_s1 + $0x100] sm:$0xff]  ;;  %s3283_s10 = sand.u32 1, %s2889_s22  }
  0x1a   : > { %s257_s28 = scalar_lea.vmem %s3429_s0, %s2340_s15  ;;  %v2712_v50 = vpack.c.bf16 %v290_v48, %v289_v47  ;;  %v292_v52 = vld [vmem:[%s3430_s1 + $0x108] sm:$0xff]  ;;  %v295_v53 = vld [vmem:[%s3430_s1 + $0x120] sm:$0xff]  ;;  %v293_v57 = vld [vmem:[%s3430_s1 + $0x110] sm:$0xff]  ;;  %s2339_s11 = sshll.u32 %s3283_s10, 5 }
  0x1b   : > { %v3038_v18 = vld [vmem:[%s257_s28] sm:$0xff]  ;;  %v296_v54 = vld [vmem:[%s3430_s1 + $0x128] sm:$0xff]  ;;  %v2715_v55 = vpack.c.bf16 %v292_v52, %v291_v51  ;;  %v294_v58 = vld [vmem:[%s3430_s1 + $0x118] sm:$0xff]  ;;  %s3294_s16 = scalar_lea.vmem [#allocation4], %s2339_s11  ;;  %s3347_s15 = scalar_lea.hbm %s3435_s6, %s2389_s12 }
  0x1c   : > { %2483 = vmatmul.mubr.msk.f32.vlgmr.msra.gmra.mrb[0].mxu0 %vm391_vm1, %v3038_v18  ;;  %2494 = vmatmul.mubr.msk.f32.vlgmr.msra.gmra.mrb[0].mxu1 %vm391_vm1, %v3038_v18  ;;  %v2721_v56 = vpack.c.bf16 %v296_v54, %v295_v53  ;;  %v297_v59 = vld [vmem:[%s3430_s1 + $0x130] sm:$0xff]  ;;  %v2718_v60 = vpack.c.bf16 %v294_v58, %v293_v57  ;;  %v298_v61 = vld [vmem:[%s3430_s1 + $0x138] sm:$0xff]  ;;  %v299_v63 = vld [vmem:[%s3430_s1 + $0x140] sm:$0xff]  ;;  %s2240_s11 = sshll.u32 %s3294_s16, 4  ;;  %s2214_s17 = scalar_lea.sflag [#allocation5], %s3283_s10  ;;  %s3342_s11 = int_to_ptr.vmem [resolvable:$true] %s2240_s11 }
  0x1d   : > { %2680 = vmatpush3.bf16.msra.mxu0 %v2679_v19  ;;  %2686 = vmatpush3.bf16.msra.mxu1 %v2685_v20  ;;  %v2724_v62 = vpack.c.bf16 %v298_v61, %v297_v59  ;;  %v300_v0 = vld [vmem:[%s3430_s1 + $0x148] sm:$0xff]  ;;  %v303_v1 = vld [vmem:[%s3430_s1 + $0x160] sm:$0xff]  ;;  %v301_v6 = vld [vmem:[%s3430_s1 + $0x150] sm:$0xff]  ;;  %s2803_s18 = scalar_lea.vmem %s3342_s11, 512  ;;  %p2810_p0 = scmp.lt.s32.totalorder %s3342_s11, %s2808_s20 }
  0x1e   : > { %2681 = vmatprep.subr.bf16.mxu0 %v2899_v3  ;;  %2687 = vmatprep.subr.bf16.mxu1 %v2899_v3  ;;  %v2727_v2 = vpack.c.bf16 %v300_v0, %v299_v63  ;;  %v304_v4 = vld [vmem:[%s3430_s1 + $0x168] sm:$0xff]  ;;  %v302_v7 = vld [vmem:[%s3430_s1 + $0x158] sm:$0xff]  ;;  %v305_v8 = vld [vmem:[%s3430_s1 + $0x170] sm:$0xff]  ;;  %p2804_p11 = scmp.ne.s32.totalorder %s3342_s11, %s2803_s18 }
  0x1f   : > { %2504 = vmatprep.mubr.msk.f32.mxu0 %vm2900_vm0, %v2901_v11  ;;  %2515 = vmatprep.mubr.msk.f32.mxu1 %vm2900_vm0, %v2901_v11  ;;  %v2733_v5 = vpack.c.bf16 %v304_v4, %v303_v1  ;;  %v2730_v9 = vpack.c.bf16 %v302_v7, %v301_v6  ;;  %v306_v10 = vld [vmem:[%s3430_s1 + $0x178] sm:$0xff]  ;;  %v2345_v21 = vld [vmem:[%s3431_s2 + $0x4] ss:$0 sm:$0xff]  ;;  %v2341_v23 = vld [vmem:[%s3431_s2] ss:$0 sm:$0xff] }
  0x20   : > { %v2736_v12 = vpack.c.bf16 %v306_v10, %v305_v8  ;;  %v2342_v27 = vld [vmem:[%s3431_s2 + $0x1] ss:$0 sm:$0xff]  ;;  %v2348_v33 = vld [vmem:[%s3431_s2 + $0x7] ss:$0 sm:$0xff]  ;;  %v2343_v35 = vld [vmem:[%s3431_s2 + $0x2] ss:$0 sm:$0xff]  ;;  %p2805_p12 = pnand %p2804_p11, %p2979_p5 }
  0x21   : > { %2683 = vmatpush3.bf16.msra.mxu0 %v2682_v25  ;;  %2689 = vmatpush3.bf16.msra.mxu1 %v2688_v26  ;;  %v2344_v39 = vld [vmem:[%s3431_s2 + $0x3] ss:$0 sm:$0xff]  ;;  %v2350_v45 = vld [vmem:[%s3431_s2 + $0x9] ss:$0 sm:$0xff] }
  0x22   : > { %2690 = vmatprep.subr.bf16.mxu0 %v2899_v3  ;;  %2696 = vmatprep.subr.bf16.mxu1 %v2899_v3  ;;  %p2806_p13 = pneg %p2805_p12 }
  0x24   : > { %2505 = vmatmul.mubr.msk.f32.vlgmr.msra.gmra.mrb[2].mxu0 %vm391_vm1, %v3038_v18  ;;  %2516 = vmatmul.mubr.msk.f32.vlgmr.msra.gmra.mrb[2].mxu1 %vm391_vm1, %v3038_v18 }
  0x25   : > { %2692 = vmatpush3.bf16.msra.mxu0 %v2691_v31  ;;  %2698 = vmatpush3.bf16.msra.mxu1 %v2697_v32  ;;  %v2347_v32 = vld [vmem:[%s3431_s2 + $0x6] ss:$0 sm:$0xff] }
  0x26   : > { %2693 = vmatprep.subr.bf16.mxu0 %v2899_v3  ;;  %2699 = vmatprep.subr.bf16.mxu1 %v2899_v3 }
  0x27   : > { %2526 = vmatprep.mubr.msk.f32.mxu0 %vm2900_vm0, %v2901_v11  ;;  %2537 = vmatprep.mubr.msk.f32.mxu1 %vm2900_vm0, %v2901_v11 }
  0x29   : > { %2695 = vmatpush3.bf16.msra.mxu0 %v2694_v37  ;;  %2701 = vmatpush3.bf16.msra.mxu1 %v2700_v38 }
  0x2a   : > { %2702 = vmatprep.subr.bf16.mxu0 %v2899_v3  ;;  %2708 = vmatprep.subr.bf16.mxu1 %v2899_v3 }
  0x2c   : > { %2527 = vmatmul.mubr.msk.f32.vlgmr.msra.gmra.mrb[4].mxu0 %vm391_vm1, %v3038_v18  ;;  %2538 = vmatmul.mubr.msk.f32.vlgmr.msra.gmra.mrb[4].mxu1 %vm391_vm1, %v3038_v18 }
  0x2d   : > { %2704 = vmatpush3.bf16.msra.mxu0 %v2703_v43  ;;  %2710 = vmatpush3.bf16.msra.mxu1 %v2709_v44  ;;  %v2349_v44 = vld [vmem:[%s3431_s2 + $0x8] ss:$0 sm:$0xff] }
  0x2e   : > { %2705 = vmatprep.subr.bf16.mxu0 %v2899_v3  ;;  %2711 = vmatprep.subr.bf16.mxu1 %v2899_v3 }
  0x2f   : > { %2548 = vmatprep.mubr.msk.f32.mxu0 %vm2900_vm0, %v2901_v11  ;;  %2559 = vmatprep.mubr.msk.f32.mxu1 %vm2900_vm0, %v2901_v11 }
  0x31   : > { %2707 = vmatpush3.bf16.msra.mxu0 %v2706_v49  ;;  %2713 = vmatpush3.bf16.msra.mxu1 %v2712_v50 }
  0x32   : > { %2714 = vmatprep.subr.bf16.mxu0 %v2899_v3  ;;  %2720 = vmatprep.subr.bf16.mxu1 %v2899_v3 }
  0x34   : > { %2549 = vmatmul.mubr.msk.f32.vlgmr.msra.gmra.mrb[6].mxu0 %vm391_vm1, %v3038_v18  ;;  %2560 = vmatmul.mubr.msk.f32.vlgmr.msra.gmra.mrb[6].mxu1 %vm391_vm1, %v3038_v18 }
  0x35   : > { %2716 = vmatpush3.bf16.msra.mxu0 %v2715_v55  ;;  %2722 = vmatpush3.bf16.msra.mxu1 %v2721_v56 }
  0x36   : > { %2717 = vmatprep.subr.bf16.mxu0 %v2899_v3  ;;  %2723 = vmatprep.subr.bf16.mxu1 %v2899_v3 }
  0x37   : > { %2570 = vmatprep.mubr.msk.f32.mxu0 %vm2900_vm0, %v2901_v11  ;;  %2581 = vmatprep.mubr.msk.f32.mxu1 %vm2900_vm0, %v2901_v11 }
  0x39   : > { %2719 = vmatpush3.bf16.msra.mxu0 %v2718_v60  ;;  %2725 = vmatpush3.bf16.msra.mxu1 %v2724_v62 }
  0x3a   : > { %2726 = vmatprep.subr.bf16.mxu0 %v2899_v3  ;;  %2732 = vmatprep.subr.bf16.mxu1 %v2899_v3 }
  0x3c   : > { %2571 = vmatmul.mubr.msk.f32.vlgmr.msra.gmra.mrb[8].mxu0 %vm391_vm1, %v3038_v18  ;;  %2582 = vmatmul.mubr.msk.f32.vlgmr.msra.gmra.mrb[8].mxu1 %vm391_vm1, %v3038_v18 }
  0x3d   : > { %2728 = vmatpush3.bf16.msra.mxu0 %v2727_v2  ;;  %2734 = vmatpush3.bf16.msra.mxu1 %v2733_v5 }
  0x3e   : > { %2729 = vmatprep.subr.bf16.mxu0 %v2899_v3  ;;  %2735 = vmatprep.subr.bf16.mxu1 %v2899_v3 }
  0x3f   : > { %2592 = vmatprep.mubr.msk.f32.mxu0 %vm2900_vm0, %v2901_v11  ;;  %2603 = vmatprep.mubr.msk.f32.mxu1 %vm2900_vm0, %v2901_v11 }
  0x41   : > { %2731 = vmatpush3.bf16.msra.mxu0 %v2730_v9  ;;  %2737 = vmatpush3.bf16.msra.mxu1 %v2736_v12 }
  0x42   : > { %2606 = vmatprep.subr.mxu0 %v2901_v11  ;;  %2611 = vmatprep.subr.mxu1 %v2901_v11 }
  0x44   : > { %2593 = vmatmul.mubr.msk.f32.vlgmr.msra.gmra.mrb[10].mxu0 %vm391_vm1, %v3038_v18  ;;  %2604 = vmatmul.mubr.msk.f32.vlgmr.msra.gmra.mrb[10].mxu1 %vm391_vm1, %v3038_v18  ;;  %v2346_v18 = vld [vmem:[%s3431_s2 + $0x5] ss:$0 sm:$0xff] }
  0x45   : > { %2608 = vmatprep.mubr.msk.f32.mxu0 %vm2900_vm0, %v2901_v11  ;;  %2613 = vmatprep.mubr.msk.f32.mxu1 %vm2900_vm0, %v2901_v11 }
  0xef   : > { %v461_v3 = vpop.f32.mrb[0].mxu0  ;;  %v531_v14 = vpop.f32.mrb[0].mxu1 }
  0xf0   : > { %v2484_v13 = vpop.f32.mrb[1].mxu0  ;;  %v2495_v15 = vpop.f32.mrb[1].mxu1  ;;  %v462_v30 = vadd.f32 %v2341_v23, %v461_v3  ;;  %v532_v31 = vadd.f32 %v2342_v27, %v531_v14 }
  0xf7   : > { %v601_v16 = vpop.f32.mrb[2].mxu0  ;;  %v671_v19 = vpop.f32.mrb[2].mxu1 }
  0xf8   : > { %v2506_v17 = vpop.f32.mrb[3].mxu0  ;;  %v2517_v20 = vpop.f32.mrb[3].mxu1  ;;  %v602_v42 = vadd.f32 %v2343_v35, %v601_v16  ;;  %v672_v43 = vadd.f32 %v2344_v39, %v671_v19 }
  0xff   : > { %v741_v22 = vpop.f32.mrb[4].mxu0  ;;  %v811_v25 = vpop.f32.mrb[4].mxu1 }
 0x100   : > { %v742_v24 = vadd.f32 %v2345_v21, %v741_v22  ;;  %v2528_v26 = vpop.f32.mrb[5].mxu0  ;;  %v812_v28 = vadd.f32 %v2346_v18, %v811_v25  ;;  %v2539_v29 = vpop.f32.mrb[5].mxu1 }
 0x102   : > { %2607 = vmatpush3.xpose.msk.msra.mxu0 %vm1235_vm2, %v742_v24  ;;  %2612 = vmatpush3.xpose.msk.msra.mxu1 %vm1235_vm2, %v812_v28 }
 0x103   : > { %2616 = vmatprep.subr.mxu0 %v2901_v11  ;;  %2621 = vmatprep.subr.mxu1 %v2901_v11 }
 0x105   : > { %2609 = vmatmul.mubr.msk.f32.vlgmr.msra.gmra.mrb[12].mxu0 %vm1235_vm2, %v462_v30  ;;  %2614 = vmatmul.mubr.msk.f32.vlgmr.msra.gmra.mrb[12].mxu1 %vm1235_vm2, %v532_v31 }
 0x106   : > { %2618 = vmatprep.mubr.msk.f32.mxu0 %vm2900_vm0, %v2901_v11  ;;  %2623 = vmatprep.mubr.msk.f32.mxu1 %vm2900_vm0, %v2901_v11 }
 0x107   : > { %v881_v34 = vpop.f32.mrb[6].mxu0  ;;  %v951_v37 = vpop.f32.mrb[6].mxu1 }
 0x108   : > { %v882_v36 = vadd.f32 %v2347_v32, %v881_v34  ;;  %v2550_v38 = vpop.f32.mrb[7].mxu0  ;;  %v952_v40 = vadd.f32 %v2348_v33, %v951_v37  ;;  %v2561_v41 = vpop.f32.mrb[7].mxu1  ;;  %v2351_v37 = vld [vmem:[%s3431_s2 + $0xa] ss:$0 sm:$0xff] }
 0x10a   : > { %2617 = vmatpush3.xpose.msk.msra.mxu0 %vm1235_vm2, %v882_v36  ;;  %2622 = vmatpush3.xpose.msk.msra.mxu1 %vm1235_vm2, %v952_v40 }
 0x10b   : > { %2626 = vmatprep.subr.mxu0 %v2901_v11  ;;  %2631 = vmatprep.subr.mxu1 %v2901_v11 }
 0x10d   : > { %2619 = vmatmul.mubr.msk.f32.vlgmr.msra.gmra.mrb[14].mxu0 %vm1235_vm2, %v602_v42  ;;  %2624 = vmatmul.mubr.msk.f32.vlgmr.msra.gmra.mrb[14].mxu1 %vm1235_vm2, %v672_v43 }
 0x10e   : > { %2628 = vmatprep.mubr.msk.f32.mxu0 %vm2900_vm0, %v2901_v11  ;;  %2633 = vmatprep.mubr.msk.f32.mxu1 %vm2900_vm0, %v2901_v11 }
 0x10f   : > { %v1021_v46 = vpop.f32.mrb[8].mxu0  ;;  %v1091_v49 = vpop.f32.mrb[8].mxu1 }
 0x110   : > { %v1022_v47 = vadd.f32 %v2349_v44, %v1021_v46  ;;  %v2572_v48 = vpop.f32.mrb[9].mxu0  ;;  %v1092_v50 = vadd.f32 %v2350_v45, %v1091_v49  ;;  %v2583_v51 = vpop.f32.mrb[9].mxu1  ;;  %v2352_v44 = vld [vmem:[%s3431_s2 + $0xb] ss:$0 sm:$0xff] }
 0x112   : > { %2627 = vmatpush3.msra.mxu0 %v1022_v47  ;;  %2632 = vmatpush3.msra.mxu1 %v1092_v50 }
 0x113   : > { %2636 = vmatprep.subr.mxu0 %v2901_v11  ;;  %2641 = vmatprep.subr.mxu1 %v2901_v11 }
 0x117   : > { %v3270_v52 = vpop.f32.mrb[10].mxu0  ;;  %v3272_v53 = vpop.f32.mrb[10].mxu1 }
 0x118   : > { %v2594_v54 = vpop.f32.mrb[11].mxu0  ;;  %v2605_v55 = vpop.f32.mrb[11].mxu1  ;;  %v1162_v43 = vadd.f32 %v2351_v37, %v3270_v52  ;;  %v1232_v50 = vadd.f32 %v2352_v44, %v3272_v53 }
 0x1d8   : > { %v1308_v56 = vpop.f32.mrb[12].mxu0  ;;  %v1384_v58 = vpop.f32.mrb[12].mxu1 }
 0x1d9   : > { %v1540_v57 = vmul.f32 0.35355338, %v1308_v56  ;;  %v2610_v59 = vpop.f32.mrb[13].mxu0  ;;  %v2615_v60 = vpop.f32.mrb[13].mxu1  ;;  %v1541_v61 = vmul.f32 0.35355338, %v1384_v58 }
 0x1da   : > { %v1897_v58 = vld [vmem:[%s3432_s3 + $0x8] sm:$0xff]  ;;  %v1898_v59 = vld [vmem:[%s3432_s3 + $0x10] sm:$0xff] }
 0x1db   : > { %v1544_v62 = vsel %vm1235_vm2, %v1540_v57, -inf  ;;  %v1547_v63 = vsel %vm1235_vm2, %v1541_v61, -inf }
 0x1dc   : > { %1545 = vmax.xlane.f32.xlu0 %v1544_v62  ;;  %v1899_v62 = vld [vmem:[%s3432_s3 + $0x18] sm:$0xff] }
 0x1e0   : > { %1548 = vmax.xlane.f32.xlu0 %v1547_v63  ;;  %v1460_v0 = vpop.f32.mrb[14].mxu0  ;;  %v1536_v1 = vpop.f32.mrb[14].mxu1 }
 0x1e1   : > { %v1542_v2 = vmul.f32 0.35355338, %v1460_v0  ;;  %v2620_v4 = vpop.f32.mrb[15].mxu0  ;;  %v2625_v5 = vpop.f32.mrb[15].mxu1  ;;  %v1543_v6 = vmul.f32 0.35355338, %v1536_v1 }
 0x1e3   : > { %v1550_v7 = vsel %vm1235_vm2, %v1542_v2, -inf  ;;  %v1553_v8 = vsel %vm1235_vm2, %v1543_v6, -inf }
 0x1e4   : > { %1551 = vmax.xlane.f32.xlu1 %v1550_v7 }
 0x1e8   : > { %1554 = vmax.xlane.f32.xlu1 %v1553_v8 }
 0x269   : > { %v1546_v9 = vpop.xlane.xlu0 %1545 }
 0x26a   : > { %v1556_v10 = vsub.f32 %v1540_v57, %v1546_v9  ;;  %v1896_v57 = vld [vmem:[%s3432_s3] sm:$0xff] }
 0x26c   : > { %v1560_v12 = vmul.f32 1.442695, %v1556_v10 }
 0x26d   : > { %v1549_v3 = vpop.xlane.xlu0 %1548 }
 0x26e   : > { %2787 = vpow2.f32 %v1560_v12  ;;  %v1557_v13 = vsub.f32 %v1541_v61, %v1549_v3 }
 0x270   : > { %v1562_v14 = vmul.f32 1.442695, %v1557_v13 }
 0x271   : > { %v1552_v15 = vpop.xlane.xlu1 %1551 }
 0x272   : > { %2789 = vpow2.f32 %v1562_v14  ;;  %v1558_v16 = vsub.f32 %v1542_v2, %v1552_v15 }
 0x274   : > { %v1564_v17 = vmul.f32 1.442695, %v1558_v16 }
 0x275   : > { %v1555_v19 = vpop.xlane.xlu1 %1554 }
 0x276   : > { %2791 = vpow2.f32 %v1564_v17  ;;  %v1559_v20 = vsub.f32 %v1543_v6, %v1555_v19 }
 0x278   : > { %v2788_v21 = vpop.eup %2787  ;;  %v1566_v18 = vmul.f32 1.442695, %v1559_v20 }
 0x279   : > { %v1568_v22 = vsel %vm1235_vm2, %v2788_v21, 0.0 }
 0x27a   : > { %2793 = vpow2.f32 %v1566_v18  ;;  %1569 = vadd.xlane.f32.xlu0 %v1568_v22 }
 0x27c   : > { %v2790_v23 = vpop.eup %2789 }
 0x27d   : > { %v1571_v24 = vsel %vm1235_vm2, %v2790_v23, 0.0 }
 0x27e   : > { %1572 = vadd.xlane.f32.xlu1 %v1571_v24 }
 0x280   : > { %v2792_v25 = vpop.eup %2791 }
 0x281   : > { %v1574_v26 = vsel %vm1235_vm2, %v2792_v25, 0.0 }
 0x282   : > { %1575 = vadd.xlane.f32.xlu0 %v1574_v26 }
 0x284   : > { %v2794_v27 = vpop.eup %2793 }
 0x285   : > { %v1577_v28 = vsel %vm1235_vm2, %v2794_v27, 0.0 }
 0x286   : > { %1578 = vadd.xlane.f32.xlu1 %v1577_v28 }
 0x307   : > { %v1570_v29 = vpop.xlane.xlu0 %1569 }
 0x308   : > { %2795 = vrcp.f32 %v1570_v29 }
 0x30b   : > { %v1573_v30 = vpop.xlane.xlu1 %1572 }
 0x30c   : > { %2797 = vrcp.f32 %v1573_v30 }
 0x30f   : > { %v1576_v31 = vpop.xlane.xlu0 %1575 }
 0x310   : > { %2799 = vrcp.f32 %v1576_v31 }
 0x312   : > { %v2796_v32 = vpop.eup %2795 }
 0x313   : > { %v1584_v33 = vmul.f32 %v2796_v32, %v1570_v29  ;;  %v1579_v34 = vpop.xlane.xlu1 %1578 }
 0x314   : > { %2801 = vrcp.f32 %v1579_v34 }
 0x315   : > { %v1588_v35 = vsub.f32 2.0, %v1584_v33 }
 0x316   : > { %v2798_v36 = vpop.eup %2797 }
 0x317   : > { %v1592_v38 = vmul.f32 %v2796_v32, %v1588_v35  ;;  %v1585_v39 = vmul.f32 %v2798_v36, %v1573_v30 }
 0x319   : > { %v1596_v40 = vmul.f32 %v2788_v21, %v1592_v38  ;;  %v1589_v41 = vsub.f32 2.0, %v1585_v39 }
 0x31a   : > { %v2800_v42 = vpop.eup %2799 }
 0x31b   : > { %v1593_v45 = vmul.f32 %v2798_v36, %v1589_v41  ;;  %v1586_v46 = vmul.f32 %v2800_v42, %v1576_v31  ;;  %2629 = vmatmul.mubr.msk.f32.vlgmr.msra.gmra.mrb[16].mxu0 %vm1235_vm2, %v1596_v40  ;;  %1600 = vst.msk [vmem:[%s3294_s16] sm:$0xff] %vm1235_vm2, %v1596_v40 }
 0x31c   : > { %2637 = vmatpush3.msra.mxu0 %v1162_v43  ;;  %2638 = vmatprep.mubr.msk.f32.mxu0 %vm2900_vm0, %v2901_v11 }
 0x31d   : > { %v1597_v47 = vmul.f32 %v2790_v23, %v1593_v45  ;;  %v1590_v48 = vsub.f32 2.0, %v1586_v46  ;;  %2646 = vmatprep.subr.mxu0 %v2901_v11 }
 0x31e   : > { %v2802_v49 = vpop.eup %2801 }
 0x31f   : > { %v1594_v51 = vmul.f32 %v2800_v42, %v1590_v48  ;;  %v1587_v52 = vmul.f32 %v2802_v49, %v1579_v34  ;;  %2634 = vmatmul.mubr.msk.f32.vlgmr.msra.gmra.mrb[16].mxu1 %vm1235_vm2, %v1597_v47  ;;  %1601 = vst.msk [vmem:[%s3294_s16 + $0x8] sm:$0xff] %vm1235_vm2, %v1597_v47 }
 0x320   : > { %2642 = vmatpush3.msra.mxu1 %v1232_v50  ;;  %2643 = vmatprep.mubr.msk.f32.mxu1 %vm2900_vm0, %v2901_v11 }
 0x321   : > { %v1598_v54 = vmul.f32 %v2792_v25, %v1594_v51  ;;  %v1591_v55 = vsub.f32 2.0, %v1587_v52  ;;  %2651 = vmatprep.subr.mxu1 %v2901_v11 }
 0x323   : > { %v1595_v56 = vmul.f32 %v2802_v49, %v1591_v55  ;;  %2639 = vmatmul.mubr.msk.f32.vlgmr.msra.gmra.mrb[18].mxu0 %vm1235_vm2, %v1598_v54  ;;  %1602 = vst.msk [vmem:[%s3294_s16 + $0x10] sm:$0xff] %vm1235_vm2, %v1598_v54 }
 0x324   : > { %2648 = vmatprep.mubr.msk.f32.mxu0 %vm2900_vm0, %v2901_v11  ;;  %2647 = vmatpush3.msra.mxu0 %v1896_v57 }
 0x325   : > { %v1599_v53 = vmul.f32 %v2794_v27, %v1595_v56  ;;  %2656 = vmatprep.subr.mxu0 %v2901_v11 }
 0x327   : > { %2644 = vmatmul.mubr.msk.f32.vlgmr.msra.gmra.mrb[18].mxu1 %vm1235_vm2, %v1599_v53  ;;  %1603 = vst.msk [vmem:[%s3294_s16 + $0x18] sm:$0xff] %vm1235_vm2, %v1599_v53  ;;  %s2809_s16 = scalar_lea.vmem %s2808_s20, 1024 }
 0x328   : > { %2653 = vmatprep.mubr.msk.f32.mxu1 %vm2900_vm0, %v2901_v11  ;;  %2652 = vmatpush3.msra.mxu1 %v1897_v58  ;;  %p2811_p1 = scmp.lt.s32.totalorder %s2809_s16, %s2803_s18 }
 0x329   : > { %2661 = vmatprep.subr.mxu1 %v2901_v11 }
 0x32a   : > { %p2812_p2 = por %p2811_p1, %p2810_p0 }
 0x32c   : > { %p2813_p3 = pnand %p2812_p2, %p2806_p13 }
 0x3ee   : > { %v1673_v60 = vpop.f32.mrb[16].mxu0 }
 0x3ef   : > { %v2630_v61 = vpop.f32.mrb[17].mxu0  ;;  %2649 = vmatmul.mubr.msk.f32.vlgmr.msra.gmra.mrb[20].mxu0 %vm1235_vm2, %v1673_v60 }
 0x3f0   : > { %2657 = vmatpush3.msra.mxu0 %v1898_v59  ;;  %2658 = vmatprep.mubr.msk.f32.mxu0 %vm2900_vm0, %v2901_v11 }
 0x3f2   : > { %v1746_v63 = vpop.f32.mrb[16].mxu1 }
 0x3f3   : > { %v2635_v0 = vpop.f32.mrb[17].mxu1  ;;  %2654 = vmatmul.mubr.msk.f32.vlgmr.msra.gmra.mrb[20].mxu1 %vm1235_vm2, %v1746_v63 }
 0x3f4   : > { %2662 = vmatpush3.msra.mxu1 %v1899_v62  ;;  %2663 = vmatprep.mubr.msk.f32.mxu1 %vm2900_vm0, %v2901_v11 }
 0x3f6   : > { %v1819_v1 = vpop.f32.mrb[18].mxu0 }
 0x3f7   : > { %v2640_v2 = vpop.f32.mrb[19].mxu0  ;;  %2659 = vmatmul.mubr.msk.f32.vlgmr.msra.gmra.mrb[22].mxu0 %vm1235_vm2, %v1819_v1 }
 0x3fa   : > { %v1892_v4 = vpop.f32.mrb[18].mxu1 }
 0x3fb   : > { %v2645_v5 = vpop.f32.mrb[19].mxu1  ;;  %2664 = vmatmul.mubr.msk.f32.vlgmr.msra.gmra.mrb[22].mxu1 %vm1235_vm2, %v1892_v4 }
 0x3fc   : > { %2816 = shalt.err (!%p2813_p3)
}
 0x3fd   : > { %s2817_s26 = scalar_lea.hbm %s3347_s15, 512  ;;  %s2821_s9 = scalar_lea.hbm %s3435_s6, 1024 }
 0x3fe   : > { %p2818_p4 = scmp.ne.s32.totalorder %s3347_s15, %s2817_s26  ;;  %p2822_p9 = scmp.lt.u32.totalorder %s3347_s15, %s3435_s6 }
 0x3ff   : > { %p2823_p10 = scmp.lt.u32.totalorder %s2821_s9, %s2817_s26  ;;  %p2825_p12 = scmp.lt.u32.totalorder %s2817_s26, %s3347_s15 }
 0x400   : > { %p2819_p7 = pnand %p2818_p4, %p2979_p5 }
 0x401   : > { %p2824_p11 = por %p2823_p10, %p2822_p9 }
 0x402   : > { %p2820_p8 = pneg %p2819_p7 }
 0x403   : > { %p2826_p13 = por %p2825_p12, %p2824_p11 }
 0x405   : > { %p2827_p0 = pnand %p2826_p13, %p2820_p8 }
 0x407   : > { %2830 = shalt.err (!%p2827_p0)
}
 0x408   : > { %s2903_s14 = smov 128   ;;  %s2904_s18 = smov 8   ;;  %v2381_v19 = vld [vmem:[%s3433_s4] ss:$0 sm:$0xff] }
 0x409   : > { %2739 = dma.vmem_to_hbm [thread:$0]  (%p2979_p5), %s3342_s11, 512, %s3347_s15, %s2214_s17, %s2903_s14, %s2903_s14, %s2904_s18  }
 0x40a   : > { %s2338_s19 = sshll.u32 %s3283_s10, 3  ;;  %s2384_s17 = sshll.u32 %s2962_s25, 7 }
 0x40b   : > { %s246_s20 = scalar_lea.vmem [#allocation2], %s2338_s19  ;;  %s3385_s29 = scalar_lea.hbm %s3434_s5, %s2384_s17 }
 0x40c   : > { %s2227_s16 = sshll.u32 %s246_s20, 4  ;;  %s2209_s9 = scalar_lea.sflag [#allocation3], %s3283_s10  ;;  %s3387_s16 = int_to_ptr.vmem [resolvable:$true] %s2227_s16 }
 0x40d   : > { %s2831_s12 = scalar_lea.vmem %s3387_s16, 128  ;;  %s2905_s25 = smov [#allocation2]  }
 0x40e   : > { %p2832_p1 = scmp.ne.s32.totalorder %s3387_s16, %s2831_s12  ;;  %s2835_s13 = sshll.u32 %s2905_s25, 4  ;;  %s2836_s13 = int_to_ptr.vmem [resolvable:$false] %s2835_s13 }
 0x40f   : > { %s2837_s14 = scalar_lea.vmem %s2836_s13, 256  ;;  %p2838_p4 = scmp.lt.s32.totalorder %s3387_s16, %s2836_s13 }
 0x410   : > { %p2833_p2 = pnand %p2832_p1, %p2979_p5  ;;  %p2839_p7 = scmp.lt.s32.totalorder %s2837_s14, %s2831_s12 }
 0x412   : > { %p2834_p3 = pneg %p2833_p2  ;;  %p2840_p8 = por %p2839_p7, %p2838_p4 }
 0x414   : > { %p2841_p9 = pnand %p2840_p8, %p2834_p3 }
 0x4c2   : > { %v1969_v11 = vpop.f32.mrb[20].mxu0 }
 0x4c3   : > { %v2650_v6 = vpop.f32.mrb[21].mxu0  ;;  %v2192_v8 = vsel %vm391_vm1, %v1969_v11, 0.0 }
 0x4c6   : > { %v2042_v7 = vpop.f32.mrb[20].mxu1 }
 0x4c7   : > { %v2193_v9 = vsel %vm391_vm1, %v2042_v7, 0.0  ;;  %v2655_v10 = vpop.f32.mrb[21].mxu1 }
 0x4c8   : > { %v2194_v12 = vadd.f32 %v2193_v9, %v2192_v8 }
 0x4ca   : > { %v2115_v3 = vpop.f32.mrb[22].mxu0 }
 0x4cb   : > { %v2195_v13 = vsel %vm391_vm1, %v2115_v3, 0.0  ;;  %v2660_v14 = vpop.f32.mrb[23].mxu0 }
 0x4cc   : > { %v2196_v15 = vadd.f32 %v2195_v13, %v2194_v12 }
 0x4ce   : > { %v2188_v16 = vpop.f32.mrb[22].mxu1 }
 0x4cf   : > { %v2197_v17 = vsel %vm391_vm1, %v2188_v16, 0.0  ;;  %v2665_v20 = vpop.f32.mrb[23].mxu1 }
 0x4d0   : > { %v2198_v21 = vadd.f32 %v2197_v17, %v2196_v15 }
 0x4d2   : > { %v2206_v18 = vadd.f32 %v2381_v19, %v2198_v21 }
 0x4d4   : > { %2207 = vst.msk [vmem:[%s246_s20] sm:$0xff] %vm391_vm1, %v2206_v18 }
 0x4d5   : > { %2844 = shalt.err (!%p2841_p9)
}
 0x4d6   : > { %s2845_s10 = scalar_lea.hbm %s3385_s29, 128  ;;  %s2849_s11 = scalar_lea.hbm %s3434_s5, 256 }
 0x4d7   : > { %p2846_p10 = scmp.ne.s32.totalorder %s3385_s29, %s2845_s10  ;;  %p2850_p13 = scmp.lt.u32.totalorder %s3385_s29, %s3434_s5 }
 0x4d8   : > { %p2851_p0 = scmp.lt.u32.totalorder %s2849_s11, %s2845_s10  ;;  %p2853_p2 = scmp.lt.u32.totalorder %s2845_s10, %s3385_s29 }
 0x4d9   : > { %p2847_p11 = pnand %p2846_p10, %p2979_p5 }
 0x4da   : > { %p2852_p1 = por %p2851_p0, %p2850_p13 }
 0x4db   : > { %p2848_p12 = pneg %p2847_p11 }
 0x4dc   : > { %p2854_p3 = por %p2853_p2, %p2852_p1 }
 0x4de   : > { %p2855_p4 = pnand %p2854_p3, %p2848_p12 }
 0x4e0   : > { %2858 = shalt.err (!%p2855_p4)
}
 0x4e1   : > { %2738 = dma.vmem_to_hbm [thread:$0]  (%p2979_p5), %s3387_s16, 128, %s3385_s29, %s2209_s9  }
 0x4e2 PF: > { %p2749_p7 = scmp.ge.s32.totalorder %s2897_s24, 2  ;;  %s2255_s20 = sand.u32 1, %s2885_s21  }
 0x4e3   : > { %s2256_s26 = scalar_lea.sflag [#allocation3], %s2255_s20 }
 0x4e4   : > { %p2743_p8 = pnand %p2749_p7, %p2983_p6 }
 0x4e6   : > { %2876 = dma.done.wait (!%p2743_p8), %s2256_s26, 128  }
 0x4e7   : > { %2878 = vsyncadd (!%p2743_p8), %s2256_s26, 4294967168  ;;  %s2265_s28 = scalar_lea.sflag [#allocation5], %s2255_s20 }
 0x4e8   : > { %2880 = dma.done.wait (!%p2743_p8), %s2265_s28, 512  }
 0x4e9   : > { %2882 = vsyncadd (!%p2743_p8), %s2265_s28, 4294966784  ;;  %p20_p5 = scmp.ge.s32.totalorder %s2966_s27, 4   ;;  %s3438_s21 = smov %s2889_s22 }
 0x4ea   : > { %s3439_s22 = smov %s2893_s23  ;;  %s3440_s23 = smov %s2977_s30 }
 0x4eb   : > { %s3441_s24 = smov %s2966_s27  ;;  %22 = sbr.rel (!%p20_p5) target bundleno = 5 (0x5), region = 92 }
 0x4f2   :  { %2270 = vsyncpa [#allocation3], 1 }
 0x4f3   :  { %2272 = vsyncpa [#allocation3 + $0x1], 1 }
 0x4f4   :  { %2273 = vsyncpa [#allocation5], 1 }
 0x4f5   :  { %2275 = vsyncpa [#allocation5 + $0x1], 1 }

</bundles_post_ra>
